<compile_context>
chip_gen: v7x
topology: tpu7x:2x2x1
jax: 0.10.0
libtpu: 0.0.40
codegen_flags: <defaults>
</compile_context>

<pallas_src>
import jax
import jax.numpy as jnp
from jax import lax
from jax.experimental import pallas as pl
from jax.experimental.pallas import tpu as pltpu

LANES = 128
SUBLANES = 8
MAX_SUB_ROWS = 512        # rows per in-kernel compute sub-chunk (bounds temporaries)
PAD_X = -1e9              # (x=PAD_X, t=0) contributes exactly 0 focal loss


def _round_up(a, b):
    return ((a + b - 1) // b) * b


def _sublane_quantum(*dtypes):
    # second-minor block quantum: 8 for 4-byte, 16 for 2-byte, 32 for 1-byte dtypes
    q = SUBLANES
    for d in dtypes:
        itemsize = jnp.dtype(d).itemsize
        q = max(q, SUBLANES * max(1, 4 // max(1, itemsize)))
    return q


def _num_tensorcores():
    """TensorCores per chip: 2 on v7x, 1 on v5e/v6e (conservative default 1)."""
    try:
        kind = jax.devices()[0].device_kind.lower()
    except Exception:
        return 1
    return 2 if "v7" in kind else 1


def _focal_elementwise(x, t, *, gamma, binary_targets, approx_reciprocal):
    """Element-wise focal loss on f32 tiles (numerically stable rewrite)."""
    if binary_targets:
        # For t in {0,1}: z := -x*(2t-1) = (-x if t==1 else x)  =>  |z| == |x|,
        # so a single e = exp(-|x|) is shared by the BCE softplus and the modulation.
        e = jnp.exp(-jnp.abs(x))                  # EUP
        sp = jnp.log1p(e)                         # EUP  (softplus(-|x|))
        z = jnp.where(t >= 0.5, -x, x)
        bce = jnp.maximum(z, 0.0) + sp            # == x - x*t + max(-x,0) + log(...)
        if gamma == 2.0 and approx_reciprocal:
            # exp(2*logsigmoid(z)) == sigmoid(z)^2, sigmoid(z) = [z>=0 ? 1 : e] / (1+e)
            num = jnp.where(z >= 0.0, 1.0, e)
            s = num * pl.reciprocal(1.0 + e, approx=True)   # near-free EUP rcp
            mod = s * s
        else:
            # logsigmoid(z) = min(z,0) - log1p(exp(-|z|)) = min(z,0) - sp  (exact, no divide)
            mod = jnp.exp(gamma * (jnp.minimum(z, 0.0) - sp))   # EUP
    else:
        # General soft-target path (exact PyTorch formula, stabilized).
        sp = jnp.log1p(jnp.exp(-jnp.abs(x)))
        bce = jnp.maximum(x, 0.0) - x * t + sp
        z = -x * (t * 2.0 - 1.0)
        invprobs = jnp.minimum(z, 0.0) - jnp.log1p(jnp.exp(-jnp.abs(z)))
        mod = jnp.exp(gamma * invprobs)
    return mod * bce


def _make_kernel(*, gamma, binary_targets, approx_reciprocal,
                 row_tile, sub_rows, n_tiles, valid_rows):
    n_sub = row_tile // sub_rows

    def tile_sum(x_ref, t_ref, tile_start, masked):
        def sub_chunk(r0, acc):
            x = x_ref[pl.ds(r0, sub_rows), :].astype(jnp.float32)
            t = t_ref[pl.ds(r0, sub_rows), :].astype(jnp.float32)
            if masked:
                rid = tile_start + r0 + lax.broadcasted_iota(jnp.int32, (sub_rows, 1), 0)
                valid = rid < valid_rows
                # out-of-range / garbage rows -> exact zero-loss point
                x = jnp.where(valid, x, PAD_X)
                t = jnp.where(valid, t, 0.0)
            loss = _focal_elementwise(
                x, t, gamma=gamma, binary_targets=binary_targets,
                approx_reciprocal=approx_reciprocal)
            # Sublane-block reduction only (pure VPU vreg adds); the single
            # cross-lane reduce happens once, in the wrapper.
            part = loss.reshape(sub_rows // SUBLANES, SUBLANES, LANES).sum(axis=0)
            return acc + part

        acc0 = jnp.zeros((SUBLANES, LANES), jnp.float32)
        if n_sub == 1:
            return sub_chunk(0, acc0)

        def body(j, acc):
            r0 = j * sub_rows
            if not isinstance(r0, int):
                r0 = pl.multiple_of(r0, sub_rows)
            return sub_chunk(r0, acc)

        # Real loop (not unrolled) so temporaries stay bounded at sub_rows x 128
        # regardless of the DMA tile size (v5e VMEM budget).
        return lax.fori_loop(0, n_sub, body, acc0)

    def kernel(x_ref, t_ref, out_ref):
        c = pl.program_id(0)
        i = pl.program_id(1)

        @pl.when(i == 0)
        def _init():
            out_ref[...] = jnp.zeros_like(out_ref)

        tile_start = (c * n_tiles + i) * row_tile   # global start row (unclamped)

        @pl.when(tile_start + row_tile <= valid_rows)          # full tile: no mask
        def _full():
            out_ref[...] += tile_sum(x_ref, t_ref, tile_start, False)[None]

        @pl.when(jnp.logical_and(tile_start < valid_rows,
                                 tile_start + row_tile > valid_rows))
        def _partial():                                        # ragged last tile
            out_ref[...] += tile_sum(x_ref, t_ref, tile_start, True)[None]
        # tiles entirely past valid_rows (clamped duplicates) contribute nothing

    return kernel


def _choose_tiling(rows, num_chunks, x_dtype, t_dtype, row_tile, q):
    bytes_per_row = LANES * (jnp.dtype(x_dtype).itemsize + jnp.dtype(t_dtype).itemsize)
    if row_tile is None:
        # 2 inputs x 2 pipeline buffers <= ~8 MiB; temporaries bounded separately.
        row_tile = min(4096, (8 * 1024 * 1024) // (2 * bytes_per_row))
    rows_per_chunk = pl.cdiv(rows, num_chunks)
    row_tile = min(int(row_tile), _round_up(rows_per_chunk, q), (rows // q) * q)
    row_tile = max(q, (row_tile // q) * q)
    if row_tile > MAX_SUB_ROWS:
        row_tile = (row_tile // MAX_SUB_ROWS) * MAX_SUB_ROWS
        sub_rows = MAX_SUB_ROWS
    else:
        sub_rows = row_tile
    n_tiles = pl.cdiv(rows_per_chunk, row_tile)
    return row_tile, sub_rows, n_tiles


def focal_loss(inputs, target, *, gamma=2.0, binary_targets=True,
               approx_reciprocal=False, row_tile=None, num_cores=None):
    """Equivalent of FocalLoss(gamma).forward(inputs, target).

    binary_targets=True assumes hard {0,1} targets (enables the shared-exp path);
    set False for soft / label-smoothed targets.  approx_reciprocal=True enables
    the EUP-lean sigmoid^2 path via pl.reciprocal(approx=True) (recommended on v7x).
    Narrow dtypes (e.g. bf16 logits / bf16 targets) stream as-is; the kernel upcasts.
    """
    if inputs.shape != target.shape:
        raise ValueError(
            "Target size ({}) must be the same as input size ({})".format(
                target.shape, inputs.shape))
    if inputs.ndim < 2:
        raise ValueError("focal_loss expects inputs with at least 2 dims (N, C, ...)")

    gamma = float(gamma)
    if not jnp.issubdtype(target.dtype, jnp.floating):
        # bool / int targets: cast once for layout safety (bf16/f32 pass through).
        target = target.astype(inputs.dtype)

    total = int(inputs.size)
    denom = total // int(inputs.shape[1])           # == N * prod(spatial dims)

    q = _sublane_quantum(inputs.dtype, target.dtype)
    padded_total = max(_round_up(total, LANES), q * LANES)

    x_flat = inputs.reshape(-1)                     # free: contiguous reshape
    t_flat = target.reshape(-1)
    if padded_total != total:
        # Rare path (total not a multiple of 128): pad with the exact zero-loss point.
        pad = padded_total - total
        x_flat = jnp.pad(x_flat, (0, pad), constant_values=PAD_X)
        t_flat = jnp.pad(t_flat, (0, pad), constant_values=0)
    rows = padded_total // LANES
    x2 = x_flat.reshape(rows, LANES)
    t2 = t_flat.reshape(rows, LANES)

    if num_cores is None:
        num_cores = _num_tensorcores()
    num_chunks = max(1, min(int(num_cores), 8))

    def run(num_chunks):
        rt, sub_rows, n_tiles = _choose_tiling(
            rows, num_chunks, inputs.dtype, target.dtype, row_tile, q)
        total_blocks = pl.cdiv(rows, rt)
        if num_chunks * n_tiles > total_blocks:
            def in_index(c, i):      # clamp fully-OOB blocks of the last chunk
                return (jnp.minimum(c * n_tiles + i, total_blocks - 1), 0)
        else:
            def in_index(c, i):
                return (c * n_tiles + i, 0)

        kernel = _make_kernel(
            gamma=gamma, binary_targets=binary_targets,
            approx_reciprocal=approx_reciprocal, row_tile=rt,
            sub_rows=sub_rows, n_tiles=n_tiles, valid_rows=rows)

        # Explicit, deterministic VMEM budget: double-buffered inputs + bounded temps.
        in_buf_bytes = 2 * rt * LANES * (x2.dtype.itemsize + t2.dtype.itemsize)
        tmp_bytes = 10 * sub_rows * LANES * 4
        vmem_limit = min(32 * 1024 * 1024,
                         max(16 * 1024 * 1024, in_buf_bytes + tmp_bytes + (4 << 20)))

        elems = rows * LANES
        n_transc = 3 if binary_targets else 5
        cost = pl.CostEstimate(
            flops=16 * elems,
            transcendentals=n_transc * elems,
            bytes_accessed=(x2.size * x2.dtype.itemsize
                            + t2.size * t2.dtype.itemsize
                            + num_chunks * SUBLANES * LANES * 4))

        if num_chunks > 1:
            # Genuinely shard the chunk axis across TensorCores (v7x).
            dim_sem = (pltpu.CORE_PARALLEL, pltpu.ARBITRARY)
        else:
            dim_sem = ("arbitrary", "arbitrary")

        return pl.pallas_call(
            kernel,
            out_shape=jax.ShapeDtypeStruct((num_chunks, SUBLANES, LANES), jnp.float32),
            grid_spec=pltpu.PrefetchScalarGridSpec(
                num_scalar_prefetch=0,
                grid=(num_chunks, n_tiles),
                in_specs=[pl.BlockSpec((rt, LANES), in_index),
                          pl.BlockSpec((rt, LANES), in_index)],
                out_specs=pl.BlockSpec((1, SUBLANES, LANES), lambda c, i: (c, 0, 0)),
            ),
            compiler_params=pltpu.CompilerParams(
                dimension_semantics=dim_sem,
                vmem_limit_bytes=int(vmem_limit)),
            cost_estimate=cost,
        )(x2, t2)

    try:
        partials = run(num_chunks)
    except Exception:
        if num_chunks == 1:
            raise
        partials = run(1)    # fallback if core-parallel lowering is unavailable

    total_sum = jnp.sum(partials)                   # single cross-lane reduction
    return (total_sum / denom).astype(jnp.float32)


def _focal_loss_ref(inputs, target, gamma=2.0):
    """Literal jnp transcription of the PyTorch module (reference)."""
    x = inputs.astype(jnp.float32)
    t = target.astype(jnp.float32)
    max_val = jnp.maximum(-x, 0.0)
    loss = x - x * t + max_val + jnp.log(jnp.exp(-max_val) + jnp.exp(-x - max_val))
    invprobs = jax.nn.log_sigmoid(-x * (t * 2.0 - 1.0))
    loss = jnp.exp(invprobs * gamma) * loss
    return loss.sum(axis=1).mean()


if __name__ == "__main__":
    key = jax.random.PRNGKey(0)
    k1, k2, k3, k4, k5, k6 = jax.random.split(key, 6)

    # 1) 128-aligned NCHW, f32, default (exact shared-exp) path.
    x = jax.random.normal(k1, (2, 4, 16, 16), jnp.float32) * 2.0
    t = jax.random.bernoulli(k2, 0.5, (2, 4, 16, 16)).astype(jnp.float32)
    out = jax.block_until_ready(focal_loss(x, t))
    ref = _focal_loss_ref(x, t)
    assert jnp.allclose(out, ref, rtol=1e-5, atol=1e-5), (out, ref)

    # 2) Ragged total (not a multiple of 128) -> tiny zero-loss pad path.
    xr = jax.random.normal(k3, (2, 3, 7, 5), jnp.float32) * 2.0
    tr = jax.random.bernoulli(k4, 0.5, (2, 3, 7, 5)).astype(jnp.float32)
    out_r = jax.block_until_ready(focal_loss(xr, tr))
    ref_r = _focal_loss_ref(xr, tr)
    assert jnp.allclose(out_r, ref_r, rtol=1e-5, atol=1e-5), (out_r, ref_r)

    # 3) 128-aligned but tile-ragged rows + bf16 streams: no pad copy, in-kernel
    #    row mask on the last (partial) tile, narrow-dtype inputs.
    xb = (jax.random.normal(k5, (2, 4, 16, 20), jnp.float32) * 2.0).astype(jnp.bfloat16)
    tb = jax.random.bernoulli(k6, 0.5, (2, 4, 16, 20)).astype(jnp.bfloat16)
    out_b = jax.block_until_ready(focal_loss(xb, tb))
    ref_b = _focal_loss_ref(xb.astype(jnp.float32), tb.astype(jnp.float32))
    assert jnp.allclose(out_b, ref_b, rtol=1e-4, atol=1e-4), (out_b, ref_b)

    # 4) EUP-lean approx-reciprocal variant (v7x), looser tolerance.
    out_a = jax.block_until_ready(focal_loss(x, t, approx_reciprocal=True))
    assert jnp.allclose(out_a, ref, rtol=2e-2, atol=1e-3), (out_a, ref)

    # 5) Soft targets / general-gamma fallback path.
    ts = jax.random.uniform(k4, (2, 4, 16, 16), jnp.float32)
    out_s = jax.block_until_ready(focal_loss(x, ts, gamma=1.5, binary_targets=False))
    ref_s = _focal_loss_ref(x, ts, gamma=1.5)
    assert jnp.allclose(out_s, ref_s, rtol=1e-5, atol=1e-5), (out_s, ref_s)

    # 6) Larger input: exercises the in-kernel fori_loop over 512-row sub-chunks.
    xl = jax.random.normal(k5, (2, 8, 128, 128), jnp.float32) * 2.0
    tl = jax.random.bernoulli(k6, 0.5, (2, 8, 128, 128)).astype(jnp.float32)
    out_l = jax.block_until_ready(focal_loss(xl, tl))
    ref_l = _focal_loss_ref(xl, tl)
    assert jnp.allclose(out_l, ref_l, rtol=1e-4, atol=1e-5), (out_l, ref_l)

    print("KERNEL_OK")
</pallas_src>

<mosaic_0001>
module attributes {stable_mosaic.version = 11 : i64} {
  func.func @kernel(%arg0: i32, %arg1: i32, %arg2: memref<16x128xf32, #tpu.memory_space<vmem>>, %arg3: memref<16x128xf32, #tpu.memory_space<vmem>>, %arg4: memref<1x8x128xf32, #tpu.memory_space<vmem>>) attributes {dimension_semantics = [#tpu.dimension_semantics<arbitrary>, #tpu.dimension_semantics<arbitrary>], iteration_bounds = array<i64: 1, 1>, scalar_prefetch = 0 : i64, scratch_operands = 0 : i64, tpu.core_type = #tpu.core_type<tc>, window_params = [{transform_indices = @transform_0, window_bounds = array<i64: 16, 128>}, {transform_indices = @transform_1, window_bounds = array<i64: 16, 128>}, {transform_indices = @transform_2, window_bounds = array<i64: 1, 8, 128>}]} {
    %c0_i32 = arith.constant 0 : i32
    %0 = arith.cmpi eq, %arg1, %c0_i32 : i32
    %1 = arith.extui %0 : i1 to i32
    %c0_i32_0 = arith.constant 0 : i32
    %2 = arith.cmpi ne, %1, %c0_i32_0 : i32
    scf.if %2 {
      %cst = arith.constant 0.000000e+00 : f32
      %16 = vector.broadcast %cst : f32 to vector<1x8x128xf32>
      %c0 = arith.constant 0 : index
      %c0_8 = arith.constant 0 : index
      %c0_9 = arith.constant 0 : index
      %17 = vector.load %arg4[%c0, %c0_8, %c0_9] : memref<1x8x128xf32, #tpu.memory_space<vmem>>, vector<1x8x128xf32>
      tpu.vector_store %arg4[%c0, %c0_8, %c0_9], %16 {strides = array<i32>} : memref<1x8x128xf32, #tpu.memory_space<vmem>>, vector<1x8x128xf32>,
    } else {
    }
    %c1_i32 = arith.constant 1 : i32
    %3 = arith.muli %arg0, %c1_i32 : i32
    %4 = arith.addi %3, %arg1 : i32
    %c16_i32 = arith.constant 16 : i32
    %5 = arith.muli %4, %c16_i32 : i32
    %c16_i32_1 = arith.constant 16 : i32
    %6 = arith.addi %5, %c16_i32_1 : i32
    %c16_i32_2 = arith.constant 16 : i32
    %7 = arith.cmpi sle, %6, %c16_i32_2 : i32
    %8 = arith.extui %7 : i1 to i32
    %c0_i32_3 = arith.constant 0 : i32
    %9 = arith.cmpi ne, %8, %c0_i32_3 : i32
    scf.if %9 {
      %c0 = arith.constant 0 : index
      %c0_8 = arith.constant 0 : index
      %c0_9 = arith.constant 0 : index
      %16 = vector.load %arg4[%c0, %c0_8, %c0_9] : memref<1x8x128xf32, #tpu.memory_space<vmem>>, vector<1x8x128xf32>
      %cst = arith.constant 0.000000e+00 : f32
      %17 = vector.broadcast %cst : f32 to vector<8x128xf32>
      %c0_10 = arith.constant 0 : index
      %c0_11 = arith.constant 0 : index
      %18 = vector.load %arg2[%c0_10, %c0_11] : memref<16x128xf32, #tpu.memory_space<vmem>>, vector<16x128xf32>
      %c0_12 = arith.constant 0 : index
      %c0_13 = arith.constant 0 : index
      %19 = vector.load %arg3[%c0_12, %c0_13] : memref<16x128xf32, #tpu.memory_space<vmem>>, vector<16x128xf32>
      %20 = math.absf %18 : vector<16x128xf32>
      %cst_14 = arith.constant 0.000000e+00 : f32
      %21 = vector.broadcast %cst_14 : f32 to vector<16x128xf32>
      %22 = arith.subf %21, %20 : vector<16x128xf32>
      %23 = math.exp %22 : vector<16x128xf32>
      %24 = math.log1p %23 : vector<16x128xf32>
      %cst_15 = arith.constant 5.000000e-01 : f32
      %25 = vector.broadcast %cst_15 : f32 to vector<16x128xf32>
      %26 = arith.cmpf oge, %19, %25 : vector<16x128xf32>
      %cst_16 = arith.constant 0.000000e+00 : f32
      %27 = vector.broadcast %cst_16 : f32 to vector<16x128xf32>
      %28 = arith.subf %27, %18 : vector<16x128xf32>
      %29 = arith.select %26, %28, %18 : vector<16x128xi1>, vector<16x128xf32>
      %cst_17 = arith.constant 0.000000e+00 : f32
      %30 = vector.broadcast %cst_17 : f32 to vector<16x128xf32>
      %31 = arith.maximumf %29, %30 : vector<16x128xf32>
      %32 = arith.addf %31, %24 : vector<16x128xf32>
      %cst_18 = arith.constant 0.000000e+00 : f32
      %33 = vector.broadcast %cst_18 : f32 to vector<16x128xf32>
      %34 = arith.minimumf %29, %33 : vector<16x128xf32>
      %35 = arith.subf %34, %24 : vector<16x128xf32>
      %cst_19 = arith.constant 2.000000e+00 : f32
      %36 = vector.broadcast %cst_19 : f32 to vector<16x128xf32>
      %37 = arith.mulf %36, %35 : vector<16x128xf32>
      %38 = math.exp %37 : vector<16x128xf32>
      %39 = arith.mulf %38, %32 : vector<16x128xf32>
      %40 = vector.shape_cast %39 : vector<16x128xf32> to vector<2x8x128xf32>
      %cst_20 = arith.constant dense<0.000000e+00> : vector<8x128xf32>
      %41 = vector.multi_reduction <add>, %40, %cst_20 [0] : vector<2x8x128xf32> to vector<8x128xf32>
      %42 = arith.addf %17, %41 : vector<8x128xf32>
      %43 = vector.shape_cast %42 : vector<8x128xf32> to vector<1x8x128xf32>
      %44 = arith.addf %16, %43 : vector<1x8x128xf32>
      %c0_21 = arith.constant 0 : index
      %c0_22 = arith.constant 0 : index
      %c0_23 = arith.constant 0 : index
      %45 = vector.load %arg4[%c0_21, %c0_22, %c0_23] : memref<1x8x128xf32, #tpu.memory_space<vmem>>, vector<1x8x128xf32>
      tpu.vector_store %arg4[%c0_21, %c0_22, %c0_23], %44 {strides = array<i32>} : memref<1x8x128xf32, #tpu.memory_space<vmem>>, vector<1x8x128xf32>,
    } else {
    }
    %c16_i32_4 = arith.constant 16 : i32
    %10 = arith.cmpi slt, %5, %c16_i32_4 : i32
    %c16_i32_5 = arith.constant 16 : i32
    %11 = arith.addi %5, %c16_i32_5 : i32
    %c16_i32_6 = arith.constant 16 : i32
    %12 = arith.cmpi sgt, %11, %c16_i32_6 : i32
    %13 = arith.andi %10, %12 : i1
    %14 = arith.extui %13 : i1 to i32
    %c0_i32_7 = arith.constant 0 : i32
    %15 = arith.cmpi ne, %14, %c0_i32_7 : i32
    scf.if %15 {
      %c0 = arith.constant 0 : index
      %c0_8 = arith.constant 0 : index
      %c0_9 = arith.constant 0 : index
      %16 = vector.load %arg4[%c0, %c0_8, %c0_9] : memref<1x8x128xf32, #tpu.memory_space<vmem>>, vector<1x8x128xf32>
      %cst = arith.constant 0.000000e+00 : f32
      %17 = vector.broadcast %cst : f32 to vector<8x128xf32>
      %c0_10 = arith.constant 0 : index
      %c0_11 = arith.constant 0 : index
      %18 = vector.load %arg2[%c0_10, %c0_11] : memref<16x128xf32, #tpu.memory_space<vmem>>, vector<16x128xf32>
      %c0_12 = arith.constant 0 : index
      %c0_13 = arith.constant 0 : index
      %19 = vector.load %arg3[%c0_12, %c0_13] : memref<16x128xf32, #tpu.memory_space<vmem>>, vector<16x128xf32>
      %c0_i32_14 = arith.constant 0 : i32
      %20 = arith.addi %5, %c0_i32_14 : i32
      %21 = tpu.iota {dimensions = array<i32: 0>} : vector<16x1xi32>
      %22 = vector.broadcast %20 : i32 to vector<16x1xi32>
      %23 = arith.addi %22, %21 : vector<16x1xi32>
      %c16_i32_15 = arith.constant 16 : i32
      %24 = vector.broadcast %c16_i32_15 : i32 to vector<16x1xi32>
      %25 = arith.cmpi slt, %23, %24 : vector<16x1xi32>
      %cst_16 = arith.constant -1.000000e+09 : f32
      %26 = vector.shape_cast %25 : vector<16x1xi1> to vector<16x1xi1>
      %27 = vector.broadcast %26 : vector<16x1xi1> to vector<16x128xi1>
      %28 = vector.broadcast %cst_16 : f32 to vector<16x128xf32>
      %29 = arith.select %27, %18, %28 : vector<16x128xi1>, vector<16x128xf32>
      %cst_17 = arith.constant 0.000000e+00 : f32
      %30 = vector.shape_cast %25 : vector<16x1xi1> to vector<16x1xi1>
      %31 = vector.broadcast %30 : vector<16x1xi1> to vector<16x128xi1>
      %32 = vector.broadcast %cst_17 : f32 to vector<16x128xf32>
      %33 = arith.select %31, %19, %32 : vector<16x128xi1>, vector<16x128xf32>
      %34 = math.absf %29 : vector<16x128xf32>
      %cst_18 = arith.constant 0.000000e+00 : f32
      %35 = vector.broadcast %cst_18 : f32 to vector<16x128xf32>
      %36 = arith.subf %35, %34 : vector<16x128xf32>
      %37 = math.exp %36 : vector<16x128xf32>
      %38 = math.log1p %37 : vector<16x128xf32>
      %cst_19 = arith.constant 5.000000e-01 : f32
      %39 = vector.broadcast %cst_19 : f32 to vector<16x128xf32>
      %40 = arith.cmpf oge, %33, %39 : vector<16x128xf32>
      %cst_20 = arith.constant 0.000000e+00 : f32
      %41 = vector.broadcast %cst_20 : f32 to vector<16x128xf32>
      %42 = arith.subf %41, %29 : vector<16x128xf32>
      %43 = arith.select %40, %42, %29 : vector<16x128xi1>, vector<16x128xf32>
      %cst_21 = arith.constant 0.000000e+00 : f32
      %44 = vector.broadcast %cst_21 : f32 to vector<16x128xf32>
      %45 = arith.maximumf %43, %44 : vector<16x128xf32>
      %46 = arith.addf %45, %38 : vector<16x128xf32>
      %cst_22 = arith.constant 0.000000e+00 : f32
      %47 = vector.broadcast %cst_22 : f32 to vector<16x128xf32>
      %48 = arith.minimumf %43, %47 : vector<16x128xf32>
      %49 = arith.subf %48, %38 : vector<16x128xf32>
      %cst_23 = arith.constant 2.000000e+00 : f32
      %50 = vector.broadcast %cst_23 : f32 to vector<16x128xf32>
      %51 = arith.mulf %50, %49 : vector<16x128xf32>
      %52 = math.exp %51 : vector<16x128xf32>
      %53 = arith.mulf %52, %46 : vector<16x128xf32>
      %54 = vector.shape_cast %53 : vector<16x128xf32> to vector<2x8x128xf32>
      %cst_24 = arith.constant dense<0.000000e+00> : vector<8x128xf32>
      %55 = vector.multi_reduction <add>, %54, %cst_24 [0] : vector<2x8x128xf32> to vector<8x128xf32>
      %56 = arith.addf %17, %55 : vector<8x128xf32>
      %57 = vector.shape_cast %56 : vector<8x128xf32> to vector<1x8x128xf32>
      %58 = arith.addf %16, %57 : vector<1x8x128xf32>
      %c0_25 = arith.constant 0 : index
      %c0_26 = arith.constant 0 : index
      %c0_27 = arith.constant 0 : index
      %59 = vector.load %arg4[%c0_25, %c0_26, %c0_27] : memref<1x8x128xf32, #tpu.memory_space<vmem>>, vector<1x8x128xf32>
      tpu.vector_store %arg4[%c0_25, %c0_26, %c0_27], %58 {strides = array<i32>} : memref<1x8x128xf32, #tpu.memory_space<vmem>>, vector<1x8x128xf32>,
    } else {
    }
    return
  }
  func.func @transform_0(%arg0: i32, %arg1: i32) -> (i32, i32) {
    %c1_i32 = arith.constant 1 : i32
    %0 = arith.muli %arg0, %c1_i32 : i32
    %1 = arith.addi %0, %arg1 : i32
    %c0_i32 = arith.constant 0 : i32
    %c0_i32_0 = arith.constant 0 : i32
    return %1, %c0_i32 : i32, i32
  }
  func.func @transform_1(%arg0: i32, %arg1: i32) -> (i32, i32) {
    %c1_i32 = arith.constant 1 : i32
    %0 = arith.muli %arg0, %c1_i32 : i32
    %1 = arith.addi %0, %arg1 : i32
    %c0_i32 = arith.constant 0 : i32
    %c0_i32_0 = arith.constant 0 : i32
    return %1, %c0_i32 : i32, i32
  }
  func.func @transform_2(%arg0: i32, %arg1: i32) -> (i32, i32, i32) {
    %c0_i32 = arith.constant 0 : i32
    %c0_i32_0 = arith.constant 0 : i32
    %c0_i32_1 = arith.constant 0 : i32
    return %arg0, %c0_i32, %c0_i32_0 : i32, i32, i32
  }
}

</mosaic_0001>

<bundles_post_ra>
// kernel: tpu_custom_call.1
= control target key start
LH: loop header
LB: loop body
LE: loop exit
PB: predicated region body
PF: predicated region fallthrough
CT: control target
= control target key end

     0   :  { %7 = vsyncpa [#allocation3], 0  ;;  %s362_s0 = inlined_call_operand.hbm [shape: f32[16,128], index: 0, kind: input, shape index: {}]   ;;  %s363_s1 = inlined_call_operand.hbm [shape: f32[16,128], index: 1, kind: input, shape index: {}]   ;;  %s364_s2 = inlined_call_operand.hbm [shape: f32[1,8,128], index: 2, kind: output, shape index: {}]  }
   0x1   :  { %8 = vsyncpa [#allocation6], 0 }
   0x2   :  { %9 = vsyncpa [#allocation4], 0  ;;  %s306_s9 = smov [#allocation2]   ;;  %s234_s13 = scalar_lea.hbm %s362_s0, 256 }
   0x3   :  { %s19_s10 = sshll.u32 %s306_s9, 4  ;;  %p235_p0 = scmp.ne.s32.totalorder %s362_s0, %s234_s13  ;;  %s20_s10 = int_to_ptr.vmem [resolvable:$true] %s19_s10 }
   0x4   :  { %p238_p1 = scmp.lt.u32.totalorder %s234_s13, %s362_s0 }
   0x6   :  { %p240_p2 = pnand %p238_p1, %p235_p0 }
   0x8   :  { %243 = shalt.err (!%p240_p2)
}
   0x9   :  { %s244_s18 = scalar_lea.vmem %s20_s10, 256  ;;  %p249_p4 = scmp.lt.s32.totalorder %s20_s10, %s20_s10 }
   0xa   :  { %p245_p3 = scmp.ne.s32.totalorder %s20_s10, %s244_s18  ;;  %p250_p5 = scmp.lt.s32.totalorder %s244_s18, %s244_s18 }
   0xc   :  { %p251_p6 = por %p250_p5, %p249_p4 }
   0xe   :  { %p252_p7 = pnand %p251_p6, %p245_p3 }
  0x10   :  { %255 = shalt.err (!%p252_p7)
}
  0x11   :  { %s307_s19 = smov 128   ;;  %s308_s20 = smov 8  }
  0x12   :  { %25 = dma.hbm_to_vmem [thread:$0]  %s362_s0, 256, %s20_s10, [#allocation3], %s307_s19, %s307_s19, %s308_s20  }
  0x13   :  { %s309_s23 = smov [#allocation5]   ;;  %s256_s27 = scalar_lea.hbm %s363_s1, 256 }
  0x14   :  { %s35_s24 = sshll.u32 %s309_s23, 4  ;;  %p257_p8 = scmp.ne.s32.totalorder %s363_s1, %s256_s27  ;;  %s36_s24 = int_to_ptr.vmem [resolvable:$true] %s35_s24 }
  0x15   :  { %p260_p9 = scmp.lt.u32.totalorder %s256_s27, %s363_s1 }
  0x17   :  { %p262_p10 = pnand %p260_p9, %p257_p8 }
  0x19   :  { %265 = shalt.err (!%p262_p10)
}
  0x1a   :  { %s266_s4 = scalar_lea.vmem %s36_s24, 256  ;;  %p271_p12 = scmp.lt.s32.totalorder %s36_s24, %s36_s24 }
  0x1b   :  { %p267_p11 = scmp.ne.s32.totalorder %s36_s24, %s266_s4  ;;  %p272_p13 = scmp.lt.s32.totalorder %s266_s4, %s266_s4 }
  0x1d   :  { %p273_p0 = por %p272_p13, %p271_p12 }
  0x1f   :  { %p274_p1 = pnand %p273_p0, %p267_p11 }
  0x21   :  { %277 = shalt.err (!%p274_p1)
}
  0x22   :  { %41 = dma.hbm_to_vmem [thread:$0]  %s363_s1, 256, %s36_s24, [#allocation6], %s307_s19, %s307_s19, %s308_s20  }
  0x23   :  { %300 = dma.done.wait [#allocation3], 256  }
  0x24   :  { %301 = vsyncadd [#allocation3], 4294967040 }
  0x25   :  { %302 = dma.done.wait [#allocation6], 256  }
  0x26   :  { %303 = vsyncadd [#allocation6], 4294967040  ;;  %v65_v0 = vld [vmem:[#allocation2] sm:$0xff]  ;;  %v66_v1 = vld [vmem:[#allocation2 + $0x8] sm:$0xff]  ;;  %s310_s1 = smov [#allocation7]  }
  0x27   :  { %v69_v2 = vand.u32 2147483647, %v65_v0  ;;  %v70_v3 = vand.u32 2147483647, %v66_v1  ;;  %v67_v12 = vld [vmem:[#allocation5] sm:$0xff]  ;;  %v68_v14 = vld [vmem:[#allocation5 + $0x8] sm:$0xff] }
  0x28   :  { %v97_v16 = vsub.f32 0.0, %v65_v0  ;;  %vm95_vm0 = vcmp.ge.f32.partialorder %v67_v12, 0.5  ;;  %v98_v17 = vsub.f32 0.0, %v66_v1  ;;  %vm96_vm1 = vcmp.ge.f32.partialorder %v68_v14, 0.5  ;;  %s206_s6 = sshll.u32 %s310_s1, 4  ;;  %s207_s6 = int_to_ptr.vmem [resolvable:$true] %s206_s6 }
  0x29   :  { %v71_v4 = vsub.f32 0.0, %v69_v2  ;;  %v72_v5 = vsub.f32 0.0, %v70_v3  ;;  %s278_s7 = scalar_lea.vmem %s207_s6, 128  ;;  %p283_p3 = scmp.lt.s32.totalorder %s207_s6, %s207_s6 }
  0x2a   :  { %v99_v22 = vsel %vm95_vm0, %v97_v16, %v65_v0  ;;  %v100_v23 = vsel %vm96_vm1, %v98_v17, %v66_v1  ;;  %p279_p2 = scmp.ne.s32.totalorder %s207_s6, %s278_s7  ;;  %p284_p4 = scmp.lt.s32.totalorder %s278_s7, %s278_s7 }
  0x2b   :  { %v73_v6 = vmul.f32 1.442695, %v71_v4  ;;  %v75_v7 = vmul.f32 1.442695, %v72_v5  ;;  %v105_v27 = vmin.f32 %v99_v22, 0.0  ;;  %v106_v30 = vmin.f32 %v100_v23, 0.0 }
  0x2c   :  { %v101_v40 = vmax.f32 %v99_v22, 0.0  ;;  %v102_v41 = vmax.f32 %v100_v23, 0.0  ;;  %p285_p5 = por %p284_p4, %p283_p3 }
  0x2d   :  { %222 = vpow2.f32 %v73_v6 }
  0x2e   :  { %224 = vpow2.f32 %v75_v7  ;;  %p286_p6 = pnand %p285_p5, %p279_p2 }
  0x37   :  { %v223_v8 = vpop.eup %222 }
  0x38   :  { %v225_v9 = vpop.eup %224  ;;  %v77_v10 = vadd.f32 1.0, %v223_v8  ;;  %v80_v13 = vmul.f32 -0.5, %v223_v8  ;;  %v83_v19 = vand.u32 2147483647, %v223_v8 }
  0x39   :  { %v86_v11 = vadd.f32 1.0, %v225_v9  ;;  %v89_v15 = vmul.f32 -0.5, %v225_v9  ;;  %v92_v21 = vand.u32 2147483647, %v225_v9 }
  0x3a   :  { %226 = vlog2.f32 %v77_v10  ;;  %v81_v18 = vadd.f32 1.0, %v80_v13  ;;  %vm84_vm2 = vcmp.lt.f32.partialorder %v83_v19, 0.0004427343 }
  0x3b   :  { %228 = vlog2.f32 %v86_v11  ;;  %v90_v20 = vadd.f32 1.0, %v89_v15  ;;  %vm93_vm3 = vcmp.lt.f32.partialorder %v92_v21, 0.0004427343 }
  0x3c   :  { %v82_v24 = vmul.f32 %v223_v8, %v81_v18 }
  0x3d   :  { %v91_v26 = vmul.f32 %v225_v9, %v90_v20 }
  0x44   :  { %v227_v25 = vpop.eup %226 }
  0x45   :  { %v229_v28 = vpop.eup %228  ;;  %v79_v29 = vmul.f32 0.6931472, %v227_v25 }
  0x46   :  { %v88_v31 = vmul.f32 0.6931472, %v229_v28 }
  0x47   :  { %v85_v32 = vsel %vm84_vm2, %v82_v24, %v79_v29 }
  0x48   :  { %v94_v33 = vsel %vm93_vm3, %v91_v26, %v88_v31  ;;  %v107_v34 = vsub.f32 %v105_v27, %v85_v32  ;;  %v103_v42 = vadd.f32 %v101_v40, %v85_v32 }
  0x49   :  { %v108_v35 = vsub.f32 %v106_v30, %v94_v33  ;;  %v104_v43 = vadd.f32 %v102_v41, %v94_v33 }
  0x4a   :  { %v109_v36 = vmul.f32 2.0, %v107_v34 }
  0x4b   :  { %v110_v37 = vmul.f32 2.0, %v108_v35 }
  0x4c   :  { %v111_v38 = vmul.f32 1.442695, %v109_v36 }
  0x4d   :  { %v113_v39 = vmul.f32 1.442695, %v110_v37 }
  0x4e   :  { %230 = vpow2.f32 %v111_v38 }
  0x4f   :  { %232 = vpow2.f32 %v113_v39 }
  0x58   :  { %v231_v44 = vpop.eup %230 }
  0x59   :  { %v233_v45 = vpop.eup %232  ;;  %v115_v46 = vmul.f32 %v231_v44, %v103_v42 }
  0x5a   :  { %v116_v47 = vmul.f32 %v233_v45, %v104_v43 }
  0x5c   :  { %v117_v48 = vadd.f32 %v116_v47, %v115_v46 }
  0x5e   :  { %120 = vst [vmem:[#allocation7] sm:$0xff] %v117_v48 }
  0x5f   :  { %289 = shalt.err (!%p286_p6)
}
  0x60   :  { %s290_s10 = scalar_lea.hbm %s364_s2, 128 }
  0x61   :  { %p291_p7 = scmp.ne.s32.totalorder %s364_s2, %s290_s10  ;;  %p294_p8 = scmp.lt.u32.totalorder %s290_s10, %s364_s2 }
  0x63   :  { %p296_p9 = pnand %p294_p8, %p291_p7 }
  0x65   :  { %299 = shalt.err (!%p296_p9)
}
  0x66   :  { %209 = dma.vmem_to_hbm [thread:$0]  %s207_s6, 128, %s364_s2, [#allocation4]  }
  0x67   :  { %304 = dma.done.wait [#allocation4], 128  }
  0x68   :  { %305 = vsyncadd [#allocation4], 4294967168 }
  0x69   :  { %213 = vsyncpa [#allocation3], 1 }
  0x6a   :  { %214 = vsyncpa [#allocation6], 1 }
  0x6b   :  { %215 = vsyncpa [#allocation4], 1 }

</bundles_post_ra>
